<compile_context>
chip_gen: v7x
topology: tpu7x:2x2x1
jax: 0.10.0
libtpu: 0.0.40
codegen_flags: <defaults>
</compile_context>

<pallas_src>
import jax
import jax.numpy as jnp
from jax.experimental import pallas as pl
from jax.experimental.pallas import tpu as pltpu

LANES = 128                              # vreg lane width (fast axis)
_SUBLANES_BY_ITEMSIZE = {4: 8, 2: 16, 1: 32}   # native sublane tile per dtype width
TILE_BYTES_DEFAULT = 4 * 1024 * 1024     # ~4 MiB per block buffer
VMEM_LIMIT_BYTES = 48 << 20              # 8 double-buffered 4 MiB blocks + headroom


def _add_module3_kernel(x_ref, y_ref, xy_ref, xx_ref):
    x = x_ref[...]
    xy_ref[...] = x + y_ref[...]   # x + y
    xx_ref[...] = x + x            # x + x


def _pick_tile_rows(rows, cols, itemsize, sublanes, tile_bytes):
    """Largest row-tile that keeps one block within tile_bytes."""
    budget_rows = tile_bytes // (cols * itemsize)
    budget_rows = max(sublanes, (budget_rows // sublanes) * sublanes)
    if rows <= budget_rows:
        # Single block covering the whole rows axis (a full-dim block is always
        # legal, even if rows is not a multiple of the sublane count).
        return rows
    return budget_rows


def _tiled_add(x2, y2, tile_rows, cols, n_elems):
    rows = x2.shape[0]
    grid = (pl.cdiv(rows, tile_rows),)     # ragged last block is masked by Pallas
    spec = pl.BlockSpec((tile_rows, cols), lambda i: (i, 0))
    itemsize = jnp.dtype(x2.dtype).itemsize
    cost = pl.CostEstimate(
        flops=2 * n_elems,
        transcendentals=0,
        bytes_accessed=4 * n_elems * itemsize,   # read x, read y, write 2 outputs
    )
    out_shape = (
        jax.ShapeDtypeStruct((rows, cols), x2.dtype),
        jax.ShapeDtypeStruct((rows, cols), x2.dtype),
    )
    return pl.pallas_call(
        _add_module3_kernel,
        out_shape=out_shape,
        grid=grid,
        in_specs=[spec, spec],
        out_specs=(spec, spec),
        compiler_params=pltpu.CompilerParams(
            # "parallel" lets v7x shard the row axis across its two TensorCores;
            # a no-op on single-TC v5e/v6e.
            dimension_semantics=("parallel",),
            vmem_limit_bytes=VMEM_LIMIT_BYTES,
        ),
        cost_estimate=cost,
    )(x2, y2)


def add_module3(x: jax.Array, y: jax.Array, *, tile_bytes: int = TILE_BYTES_DEFAULT):
    """Pallas implementation of AddModule3.forward(x, y) -> (x + y, x + x)."""
    assert x.shape == y.shape and x.dtype == y.dtype
    orig_shape = x.shape
    n = int(x.size)
    itemsize = jnp.dtype(x.dtype).itemsize
    sublanes = _SUBLANES_BY_ITEMSIZE.get(itemsize, 8)

    # Fast path: for inputs below roughly one native tile (e.g. the module's
    # (5,) int32 example) a plain fused XLA add beats any pallas_call launch.
    if n < sublanes * LANES:
        return x + y, x + x

    # Path A: native 2-D tiling — trailing dim already lane-aligned.
    # No pad, no post-kernel slice, no relayout of the operands.
    if (x.ndim >= 2 and orig_shape[-1] % LANES == 0
            and sublanes * orig_shape[-1] * itemsize <= tile_bytes):
        cols = orig_shape[-1]
        rows = n // cols
        x2 = x.reshape(rows, cols)
        y2 = y.reshape(rows, cols)
        tile_rows = _pick_tile_rows(rows, cols, itemsize, sublanes, tile_bytes)
        xy2, xx2 = _tiled_add(x2, y2, tile_rows, cols, n)
        return xy2.reshape(orig_shape), xx2.reshape(orig_shape)

    # Path B: flatten to a lane-dense (rows, 128) slab.  Pad only up to the
    # next 128-lane boundary (< 128 elements); the ragged last *row block* is
    # handled by the grid's cdiv + Pallas masking, so there is no padding to a
    # tile multiple and no output slice unless a lane pad was actually needed.
    xf = x.reshape(-1)
    yf = y.reshape(-1)
    rows = pl.cdiv(n, LANES)
    padded_n = rows * LANES
    pad = padded_n - n
    if pad:
        xf = jnp.pad(xf, (0, pad))
        yf = jnp.pad(yf, (0, pad))
    x2 = xf.reshape(rows, LANES)
    y2 = yf.reshape(rows, LANES)
    tile_rows = _pick_tile_rows(rows, LANES, itemsize, sublanes, tile_bytes)
    xy2, xx2 = _tiled_add(x2, y2, tile_rows, LANES, n)

    xy = xy2.reshape(-1)
    xx = xx2.reshape(-1)
    if pad:
        xy = xy[:n]
        xx = xx[:n]
    return xy.reshape(orig_shape), xx.reshape(orig_shape)


if __name__ == "__main__":
    key = jax.random.PRNGKey(0)
    ks = jax.random.split(key, 8)

    # Case 1: the module's example_input shape — (5,) int32 (tiny fast path).
    x = jax.random.randint(ks[0], (5,), -10, 10, dtype=jnp.int32)
    y = jax.random.randint(ks[1], (5,), -10, 10, dtype=jnp.int32)
    xy, xx = add_module3(x, y)
    jax.block_until_ready((xy, xx))
    assert xy.shape == (5,) and xy.dtype == jnp.int32 and xx.dtype == jnp.int32
    assert jnp.array_equal(xy, x + y) and jnp.array_equal(xx, x + x)

    # Case 2: non-128-aligned 1-D int32 — Pallas flatten path, single block.
    xb = jax.random.randint(ks[2], (5000,), -100, 100, dtype=jnp.int32)
    yb = jax.random.randint(ks[3], (5000,), -100, 100, dtype=jnp.int32)
    xyb, xxb = add_module3(xb, yb)
    jax.block_until_ready((xyb, xxb))
    assert jnp.array_equal(xyb, xb + yb) and jnp.array_equal(xxb, xb + xb)

    # Case 3: small tile_bytes forces a multi-step grid with a ragged, masked
    # last row block (exercises the no-tile-padding path at a small size).
    xc = jax.random.randint(ks[4], (70000,), -100, 100, dtype=jnp.int32)
    yc = jax.random.randint(ks[5], (70000,), -100, 100, dtype=jnp.int32)
    xyc, xxc = add_module3(xc, yc, tile_bytes=64 * 1024)
    jax.block_until_ready((xyc, xxc))
    assert jnp.array_equal(xyc, xc + yc) and jnp.array_equal(xxc, xc + xc)

    # Case 4: native 2-D path (trailing dim already a multiple of 128).
    xd = jax.random.normal(ks[6], (64, 256), dtype=jnp.float32)
    yd = jax.random.normal(ks[7], (64, 256), dtype=jnp.float32)
    xyd, xxd = add_module3(xd, yd)
    jax.block_until_ready((xyd, xxd))
    assert jnp.array_equal(xyd, xd + yd) and jnp.array_equal(xxd, xd + xd)

    print("KERNEL_OK")
</pallas_src>

<mosaic_0001>
module attributes {stable_mosaic.version = 11 : i64} {
  func.func @_add_module3_kernel(%arg0: i32, %arg1: memref<40x128xi32, #tpu.memory_space<vmem>>, %arg2: memref<40x128xi32, #tpu.memory_space<vmem>>, %arg3: memref<40x128xi32, #tpu.memory_space<vmem>>, %arg4: memref<40x128xi32, #tpu.memory_space<vmem>>) attributes {dimension_semantics = [#tpu.dimension_semantics<parallel>], iteration_bounds = array<i64: 1>, scalar_prefetch = 0 : i64, scratch_operands = 0 : i64, tpu.core_type = #tpu.core_type<tc>, window_params = [{transform_indices = @transform_0, window_bounds = array<i64: 40, 128>}, {transform_indices = @transform_1, window_bounds = array<i64: 40, 128>}, {transform_indices = @transform_2, window_bounds = array<i64: 40, 128>}, {transform_indices = @transform_3, window_bounds = array<i64: 40, 128>}]} {
    %c0 = arith.constant 0 : index
    %c0_0 = arith.constant 0 : index
    %0 = vector.load %arg1[%c0, %c0_0] : memref<40x128xi32, #tpu.memory_space<vmem>>, vector<40x128xi32>
    %c0_1 = arith.constant 0 : index
    %c0_2 = arith.constant 0 : index
    %1 = vector.load %arg2[%c0_1, %c0_2] : memref<40x128xi32, #tpu.memory_space<vmem>>, vector<40x128xi32>
    %2 = arith.addi %0, %1 : vector<40x128xi32>
    %c0_3 = arith.constant 0 : index
    %c0_4 = arith.constant 0 : index
    %3 = vector.load %arg3[%c0_3, %c0_4] : memref<40x128xi32, #tpu.memory_space<vmem>>, vector<40x128xi32>
    tpu.vector_store %arg3[%c0_3, %c0_4], %2 {strides = array<i32>} : memref<40x128xi32, #tpu.memory_space<vmem>>, vector<40x128xi32>,
    %4 = arith.addi %0, %0 : vector<40x128xi32>
    %c0_5 = arith.constant 0 : index
    %c0_6 = arith.constant 0 : index
    %5 = vector.load %arg4[%c0_5, %c0_6] : memref<40x128xi32, #tpu.memory_space<vmem>>, vector<40x128xi32>
    tpu.vector_store %arg4[%c0_5, %c0_6], %4 {strides = array<i32>} : memref<40x128xi32, #tpu.memory_space<vmem>>, vector<40x128xi32>,
    return
  }
  func.func @transform_0(%arg0: i32) -> (i32, i32) {
    %c0_i32 = arith.constant 0 : i32
    %c0_i32_0 = arith.constant 0 : i32
    return %arg0, %c0_i32 : i32, i32
  }
  func.func @transform_1(%arg0: i32) -> (i32, i32) {
    %c0_i32 = arith.constant 0 : i32
    %c0_i32_0 = arith.constant 0 : i32
    return %arg0, %c0_i32 : i32, i32
  }
  func.func @transform_2(%arg0: i32) -> (i32, i32) {
    %c0_i32 = arith.constant 0 : i32
    %c0_i32_0 = arith.constant 0 : i32
    return %arg0, %c0_i32 : i32, i32
  }
  func.func @transform_3(%arg0: i32) -> (i32, i32) {
    %c0_i32 = arith.constant 0 : i32
    %c0_i32_0 = arith.constant 0 : i32
    return %arg0, %c0_i32 : i32, i32
  }
}

</mosaic_0001>

<bundles_post_ra>
// kernel: tpu_custom_call.1
= control target key start
LH: loop header
LB: loop body
LE: loop exit
PB: predicated region body
PF: predicated region fallthrough
CT: control target
= control target key end

     0   :  { %9 = vsyncpa [#allocation3], 0  ;;  %s302_s0 = inlined_call_operand.hbm [shape: s32[40,128], index: 0, kind: input, shape index: {}]   ;;  %s303_s1 = inlined_call_operand.hbm [shape: s32[40,128], index: 1, kind: input, shape index: {}]   ;;  %s304_s2 = inlined_call_operand.hbm [shape: s32[40,128], index: 2, kind: output, shape index: {0}]   ;;  %s305_s3 = inlined_call_operand.hbm [shape: s32[40,128], index: 3, kind: output, shape index: {1}]  }
   0x1   :  { %10 = vsyncpa [#allocation6], 0 }
   0x2   :  { %11 = vsyncpa [#allocation4], 0 }
   0x3   :  { %12 = vsyncpa [#allocation9], 0  ;;  %s209_s12 = smov [#allocation2]   ;;  %s113_s16 = scalar_lea.hbm %s302_s0, 640 }
   0x4   :  { %s18_s13 = sshll.u32 %s209_s12, 4  ;;  %p114_p0 = scmp.ne.s32.totalorder %s302_s0, %s113_s16  ;;  %s19_s13 = int_to_ptr.vmem [resolvable:$true] %s18_s13 }
   0x5   :  { %p117_p1 = scmp.lt.u32.totalorder %s113_s16, %s302_s0 }
   0x7   :  { %p119_p2 = pnand %p117_p1, %p114_p0 }
   0x9   :  { %122 = shalt.err (!%p119_p2)
}
   0xa   :  { %s123_s21 = scalar_lea.vmem %s19_s13, 640  ;;  %p128_p4 = scmp.lt.s32.totalorder %s19_s13, %s19_s13 }
   0xb   :  { %p124_p3 = scmp.ne.s32.totalorder %s19_s13, %s123_s21  ;;  %p129_p5 = scmp.lt.s32.totalorder %s123_s21, %s123_s21 }
   0xd   :  { %p130_p6 = por %p129_p5, %p128_p4 }
   0xf   :  { %p131_p7 = pnand %p130_p6, %p124_p3 }
  0x11   :  { %134 = shalt.err (!%p131_p7)
}
  0x12   :  { %s210_s22 = smov 128   ;;  %s211_s23 = smov 8  }
  0x13   :  { %24 = dma.hbm_to_vmem [thread:$0]  %s302_s0, 640, %s19_s13, [#allocation3], %s210_s22, %s210_s22, %s211_s23  }
  0x14   :  { %s212_s26 = smov [#allocation5]   ;;  %s135_s30 = scalar_lea.hbm %s303_s1, 640 }
  0x15   :  { %s30_s27 = sshll.u32 %s212_s26, 4  ;;  %p136_p8 = scmp.ne.s32.totalorder %s303_s1, %s135_s30  ;;  %s31_s27 = int_to_ptr.vmem [resolvable:$true] %s30_s27 }
  0x16   :  { %p139_p9 = scmp.lt.u32.totalorder %s135_s30, %s303_s1 }
  0x18   :  { %p141_p10 = pnand %p139_p9, %p136_p8 }
  0x1a   :  { %144 = shalt.err (!%p141_p10)
}
  0x1b   :  { %s145_s8 = scalar_lea.vmem %s31_s27, 640  ;;  %p150_p12 = scmp.lt.s32.totalorder %s31_s27, %s31_s27 }
  0x1c   :  { %p146_p11 = scmp.ne.s32.totalorder %s31_s27, %s145_s8  ;;  %p151_p13 = scmp.lt.s32.totalorder %s145_s8, %s145_s8 }
  0x1e   :  { %p152_p0 = por %p151_p13, %p150_p12 }
  0x20   :  { %p153_p1 = pnand %p152_p0, %p146_p11 }
  0x22   :  { %156 = shalt.err (!%p153_p1)
}
  0x23   :  { %36 = dma.hbm_to_vmem [thread:$0]  %s303_s1, 640, %s31_s27, [#allocation6], %s210_s22, %s210_s22, %s211_s23  }
  0x24   :  { %201 = dma.done.wait [#allocation3], 640  }
  0x25   :  { %202 = vsyncadd [#allocation3], 4294966656 }
  0x26   :  { %203 = dma.done.wait [#allocation6], 640  }
  0x27   :  { %204 = vsyncadd [#allocation6], 4294966656  ;;  %v43_v0 = vld [vmem:[#allocation2] sm:$0xff]  ;;  %v48_v1 = vld [vmem:[#allocation5] sm:$0xff]  ;;  %s213_s10 = smov [#allocation8]   ;;  %s214_s12 = smov [#allocation7]  }
  0x28   :  { %v44_v2 = vld [vmem:[#allocation2 + $0x8] sm:$0xff]  ;;  %s90_s11 = sshll.u32 %s213_s10, 4  ;;  %v53_v3 = vadd.s32 %v48_v1, %v43_v0  ;;  %v49_v4 = vld [vmem:[#allocation5 + $0x8] sm:$0xff]  ;;  %v50_v6 = vld [vmem:[#allocation5 + $0x10] sm:$0xff]  ;;  %v63_v7 = vadd.s32 %v43_v0, %v43_v0  ;;  %s78_s13 = sshll.u32 %s214_s12, 4  ;;  %s91_s11 = int_to_ptr.vmem [resolvable:$true] %s90_s11  ;;  %s265_s13 = int_to_ptr.vmem [resolvable:$true] %s78_s13 }
  0x29   :  { %v45_v5 = vld [vmem:[#allocation2 + $0x10] sm:$0xff]  ;;  %v64_v8 = vadd.s32 %v44_v2, %v44_v2  ;;  %v54_v9 = vadd.s32 %v49_v4, %v44_v2  ;;  %v46_v11 = vld [vmem:[#allocation2 + $0x18] sm:$0xff]  ;;  %v51_v12 = vld [vmem:[#allocation5 + $0x18] sm:$0xff]  ;;  %s157_s1 = scalar_lea.vmem %s91_s11, 640  ;;  %p162_p3 = scmp.lt.s32.totalorder %s91_s11, %s91_s11 }
  0x2a   :  { %v55_v10 = vadd.s32 %v50_v6, %v45_v5  ;;  %v47_v13 = vld [vmem:[#allocation2 + $0x20] sm:$0xff]  ;;  %v65_v14 = vadd.s32 %v45_v5, %v45_v5  ;;  %58 = vst [vmem:[#allocation7] sm:$0xff] %v53_v3  ;;  %v56_v15 = vadd.s32 %v51_v12, %v46_v11  ;;  %v52_v16 = vld [vmem:[#allocation5 + $0x20] sm:$0xff]  ;;  %68 = vst [vmem:[#allocation8] sm:$0xff] %v63_v7  ;;  %p158_p2 = scmp.ne.s32.totalorder %s91_s11, %s157_s1  ;;  %p163_p4 = scmp.lt.s32.totalorder %s157_s1, %s157_s1 }
  0x2b   :  { %69 = vst [vmem:[#allocation8 + $0x8] sm:$0xff] %v64_v8  ;;  %v66_v17 = vadd.s32 %v46_v11, %v46_v11  ;;  %v67_v18 = vadd.s32 %v47_v13, %v47_v13  ;;  %59 = vst [vmem:[#allocation7 + $0x8] sm:$0xff] %v54_v9  ;;  %v57_v19 = vadd.s32 %v52_v16, %v47_v13 }
  0x2c   :  { %60 = vst [vmem:[#allocation7 + $0x10] sm:$0xff] %v55_v10  ;;  %70 = vst [vmem:[#allocation8 + $0x10] sm:$0xff] %v65_v14  ;;  %p164_p5 = por %p163_p4, %p162_p3 }
  0x2d   :  { %61 = vst [vmem:[#allocation7 + $0x18] sm:$0xff] %v56_v15  ;;  %71 = vst [vmem:[#allocation8 + $0x18] sm:$0xff] %v66_v17 }
  0x2e   :  { %72 = vst [vmem:[#allocation8 + $0x20] sm:$0xff] %v67_v18  ;;  %62 = vst [vmem:[#allocation7 + $0x20] sm:$0xff] %v57_v19  ;;  %p165_p6 = pnand %p164_p5, %p158_p2 }
  0x30   :  { %168 = shalt.err (!%p165_p6)
}
  0x31   :  { %s169_s16 = scalar_lea.hbm %s305_s3, 640 }
  0x32   :  { %p170_p7 = scmp.ne.s32.totalorder %s305_s3, %s169_s16  ;;  %p173_p8 = scmp.lt.u32.totalorder %s169_s16, %s305_s3 }
  0x34   :  { %p175_p9 = pnand %p173_p8, %p170_p7 }
  0x36   :  { %178 = shalt.err (!%p175_p9)
}
  0x37   :  { %96 = dma.vmem_to_hbm [thread:$0]  %s91_s11, 640, %s305_s3, [#allocation9], %s210_s22, %s210_s22, %s211_s23  }
  0x38   :  { %s179_s25 = scalar_lea.vmem %s265_s13, 640  ;;  %p184_p11 = scmp.lt.s32.totalorder %s265_s13, %s265_s13 }
  0x39   :  { %p180_p10 = scmp.ne.s32.totalorder %s265_s13, %s179_s25  ;;  %p185_p12 = scmp.lt.s32.totalorder %s179_s25, %s179_s25 }
  0x3b   :  { %p186_p13 = por %p185_p12, %p184_p11 }
  0x3d   :  { %p187_p0 = pnand %p186_p13, %p180_p10 }
  0x3f   :  { %190 = shalt.err (!%p187_p0)
}
  0x40   :  { %s191_s28 = scalar_lea.hbm %s304_s2, 640 }
  0x41   :  { %p192_p1 = scmp.ne.s32.totalorder %s304_s2, %s191_s28  ;;  %p195_p2 = scmp.lt.u32.totalorder %s191_s28, %s304_s2 }
  0x43   :  { %p197_p3 = pnand %p195_p2, %p192_p1 }
  0x45   :  { %200 = shalt.err (!%p197_p3)
}
  0x46   :  { %84 = dma.vmem_to_hbm [thread:$0]  %s265_s13, 640, %s304_s2, [#allocation4], %s210_s22, %s210_s22, %s211_s23  }
  0x47   :  { %205 = dma.done.wait [#allocation4], 640  }
  0x48   :  { %206 = vsyncadd [#allocation4], 4294966656 }
  0x49   :  { %207 = dma.done.wait [#allocation9], 640  }
  0x4a   :  { %208 = vsyncadd [#allocation9], 4294966656 }
  0x4b   :  { %103 = vsyncpa [#allocation3], 1 }
  0x4c   :  { %104 = vsyncpa [#allocation6], 1 }
  0x4d   :  { %105 = vsyncpa [#allocation4], 1 }
  0x4e   :  { %106 = vsyncpa [#allocation9], 1 }

</bundles_post_ra>
